<compile_context>
chip_gen: v5e
topology: v5e:2x2
jax: 0.10.0
libtpu: 0.0.40
codegen_flags: <defaults>
</compile_context>

<pallas_src>
import jax
import jax.numpy as jnp
from jax.experimental import pallas as pl
from jax.experimental.pallas import tpu as pltpu

_LANES = 512                 # last-dim width (multiple of 128 -> lane dense)
_ACC_ROWS = 8                # fixed small accumulator: (8, 512) f32 = 16 KiB
_VMEM_LIMIT = 32 * 1024 * 1024


def _fold_rows(x, reduce_fn):
    """Fold (tile_rows, lanes) -> (_ACC_ROWS, lanes) with elementwise VPU ops.

    The reshape splits the sublane axis on (8, lanes) boundaries, so it is a
    layout no-op; the leading-axis reduce lowers to plain vector adds/maxes.
    """
    tile_rows, lanes = x.shape
    g = tile_rows // _ACC_ROWS
    if g == 1:
        return x
    return reduce_fn(x.reshape(g, _ACC_ROWS, lanes), axis=0)


# ---------------------------------------------------------------------------
# Pass 1: max of `variance` over the aligned main region.
# ---------------------------------------------------------------------------
def _max_kernel(v_ref, out_ref, acc_ref):
    i = pl.program_id(0)

    @pl.when(i == 0)
    def _():
        acc_ref[...] = jnp.full(acc_ref.shape, -jnp.inf, acc_ref.dtype)

    v = v_ref[...].astype(jnp.float32)
    acc_ref[...] = jnp.maximum(acc_ref[...], _fold_rows(v, jnp.max))

    @pl.when(i == pl.num_programs(0) - 1)
    def _():
        # Single small cross-lane reduce, broadcast into the output block.
        out_ref[...] = jnp.full(out_ref.shape, jnp.max(acc_ref[...]), jnp.float32)


# ---------------------------------------------------------------------------
# Pass 2: sum of | |target - mean| - variance * inv_vmax | over the main region.
# inv_vmax is a (1, 1) f32 scalar living in SMEM.
# ---------------------------------------------------------------------------
def _loss_kernel(inv_vmax_ref, mean_ref, var_ref, tgt_ref, out_ref, acc_ref):
    i = pl.program_id(0)

    @pl.when(i == 0)
    def _():
        acc_ref[...] = jnp.zeros(acc_ref.shape, acc_ref.dtype)

    inv_vmax = inv_vmax_ref[0, 0]
    mean = mean_ref[...].astype(jnp.float32)
    var = var_ref[...].astype(jnp.float32)
    tgt = tgt_ref[...].astype(jnp.float32)

    d = jnp.abs(jnp.abs(tgt - mean) - var * inv_vmax)
    acc_ref[...] += _fold_rows(d, jnp.sum)

    @pl.when(i == pl.num_programs(0) - 1)
    def _():
        out_ref[...] = jnp.full(out_ref.shape, jnp.sum(acc_ref[...]), jnp.float32)


# ---------------------------------------------------------------------------
# Wrapper
# ---------------------------------------------------------------------------
def calibration_loss(mean, variance, target, *,
                     tile_rows_pass1=2048, tile_rows_pass2=1024):
    assert mean.shape == variance.shape == target.shape
    n = int(mean.size)
    assert n > 0

    lanes = _LANES
    mean_f = mean.reshape(-1)
    var_f = variance.reshape(-1)
    tgt_f = target.reshape(-1)

    # --- choose tile sizes / aligned prefix length (all static Python) ------
    t2 = max(_ACC_ROWS, (int(tile_rows_pass2) // 8) * 8)
    t1 = max(t2, (int(tile_rows_pass1) // 8) * 8)

    rows_avail = n // lanes
    rows8 = (rows_avail // 8) * 8
    if rows8 >= 8:
        t2 = min(t2, rows8)
        t1 = min(t1, rows8)
        t1 = (t1 // t2) * t2            # pass-1 tile is a multiple of pass-2 tile
        rows_main = (rows8 // t1) * t1  # main region is a multiple of both tiles
    else:
        rows_main = 0
    n_main = rows_main * lanes
    n_tail = n - n_main

    vmax_main = None
    if n_main > 0:
        def _main2d(x):
            # Prefix slice + reshape: no padding, no in-kernel masking.
            return x[:n_main].reshape(rows_main, lanes)

        mean2d, var2d, tgt2d = _main2d(mean_f), _main2d(var_f), _main2d(tgt_f)

        part_shape = jax.ShapeDtypeStruct((_ACC_ROWS, 128), jnp.float32)
        part_spec = pl.BlockSpec((_ACC_ROWS, 128), lambda i: (0, 0))
        acc_scratch = pltpu.VMEM((_ACC_ROWS, lanes), jnp.float32)
        cparams = pltpu.CompilerParams(
            dimension_semantics=("arbitrary",),
            vmem_limit_bytes=_VMEM_LIMIT,
        )

        # ---- Pass 1: max of variance over the main region. ----
        max_part = pl.pallas_call(
            _max_kernel,
            out_shape=part_shape,
            grid=(rows_main // t1,),
            in_specs=[pl.BlockSpec((t1, lanes), lambda i: (i, 0))],
            out_specs=part_spec,
            scratch_shapes=[acc_scratch],
            compiler_params=cparams,
        )(var2d)
        vmax_main = max_part[0, 0]

    if n_tail > 0:
        mean_t = mean_f[n_main:].astype(jnp.float32)
        var_t = var_f[n_main:].astype(jnp.float32)
        tgt_t = tgt_f[n_main:].astype(jnp.float32)
        vmax_tail = jnp.max(var_t)

    if n_main > 0 and n_tail > 0:
        vmax = jnp.maximum(vmax_main, vmax_tail)
    elif n_main > 0:
        vmax = vmax_main
    else:
        vmax = vmax_tail

    inv_vmax = (1.0 / vmax).astype(jnp.float32)

    total = jnp.float32(0.0)
    if n_main > 0:
        # ---- Pass 2: sum of | |target-mean| - variance*inv_vmax | ----
        sum_part = pl.pallas_call(
            _loss_kernel,
            out_shape=part_shape,
            grid=(rows_main // t2,),
            in_specs=[
                pl.BlockSpec(memory_space=pltpu.MemorySpace.SMEM),  # inv_vmax
                pl.BlockSpec((t2, lanes), lambda i: (i, 0)),        # mean
                pl.BlockSpec((t2, lanes), lambda i: (i, 0)),        # variance
                pl.BlockSpec((t2, lanes), lambda i: (i, 0)),        # target
            ],
            out_specs=part_spec,
            scratch_shapes=[acc_scratch],
            compiler_params=cparams,
        )(inv_vmax.reshape(1, 1), mean2d, var2d, tgt2d)
        total = total + sum_part[0, 0]

    if n_tail > 0:
        total = total + jnp.sum(jnp.abs(jnp.abs(tgt_t - mean_t) - var_t * inv_vmax))

    return total * jnp.float32(1.0 / n)


def calibration_loss_ref(mean, variance, target):
    error = jnp.abs(target - mean)
    normalized_variance = variance / jnp.max(variance)
    return jnp.mean(jnp.abs(error - normalized_variance))


if __name__ == "__main__":
    key = jax.random.PRNGKey(0)
    ks = jax.random.split(key, 12)

    def make(shape, ka, kb, kc):
        m = jax.random.normal(ka, shape, dtype=jnp.float32)
        v = jax.nn.softplus(jax.random.normal(kb, shape, dtype=jnp.float32))
        t = jax.random.normal(kc, shape, dtype=jnp.float32)
        return m, v, t

    # Case 1: unaligned trajectory tensors -> kernel main region + jnp tail.
    m1, v1, g1 = make((4, 24, 50), ks[0], ks[1], ks[2])        # 4800 elements
    out1 = calibration_loss(m1, v1, g1)
    jax.block_until_ready(out1)
    ref1 = calibration_loss_ref(m1, v1, g1)
    assert jnp.allclose(out1, ref1, rtol=2e-5, atol=1e-6), (out1, ref1)

    # Case 2: aligned input, multi-step grid in both passes (small forced tiles).
    m2, v2, g2 = make((8, 32, 64), ks[3], ks[4], ks[5])        # 16384 = 32 rows
    out2 = calibration_loss(m2, v2, g2, tile_rows_pass1=16, tile_rows_pass2=8)
    jax.block_until_ready(out2)
    ref2 = calibration_loss_ref(m2, v2, g2)
    assert jnp.allclose(out2, ref2, rtol=2e-5, atol=1e-6), (out2, ref2)

    # Case 3: aligned input, default tile sizes (exercises row folding, g > 1).
    m3, v3, g3 = make((16, 64, 64), ks[6], ks[7], ks[8])       # 65536 = 128 rows
    out3 = calibration_loss(m3, v3, g3)
    jax.block_until_ready(out3)
    ref3 = calibration_loss_ref(m3, v3, g3)
    assert jnp.allclose(out3, ref3, rtol=2e-5, atol=1e-6), (out3, ref3)

    # Case 4: tiny input -> pure-jnp fallback path (no full (8, 512) block).
    m4, v4, g4 = make((2, 16, 8), ks[9], ks[10], ks[11])       # 256 elements
    out4 = calibration_loss(m4, v4, g4)
    jax.block_until_ready(out4)
    ref4 = calibration_loss_ref(m4, v4, g4)
    assert jnp.allclose(out4, ref4, rtol=2e-5, atol=1e-6), (out4, ref4)

    print("KERNEL_OK")
</pallas_src>

<mosaic_0001>
module attributes {stable_mosaic.version = 11 : i64} {
  func.func @_max_kernel(%arg0: i32, %arg1: memref<8x512xf32, #tpu.memory_space<vmem>>, %arg2: memref<8x128xf32, #tpu.memory_space<vmem>>, %arg3: memref<8x512xf32, #tpu.memory_space<vmem>>) attributes {dimension_semantics = [#tpu.dimension_semantics<arbitrary>], iteration_bounds = array<i64: 1>, scalar_prefetch = 0 : i64, scratch_operands = 1 : i64, tpu.core_type = #tpu.core_type<tc>, window_params = [{transform_indices = @transform_0, window_bounds = array<i64: 8, 512>}, {pipeline_mode = #tpu.pipeline_mode<synchronous>, transform_indices = @transform_1, window_bounds = array<i64: 8, 128>}]} {
    %c0_i32 = arith.constant 0 : i32
    %0 = arith.cmpi eq, %arg0, %c0_i32 : i32
    %1 = arith.extui %0 : i1 to i32
    %c0_i32_0 = arith.constant 0 : i32
    %2 = arith.cmpi ne, %1, %c0_i32_0 : i32
    scf.if %2 {
      %cst = arith.constant 0xFF800000 : f32
      %10 = vector.broadcast %cst : f32 to vector<8x512xf32>
      %c0_8 = arith.constant 0 : index
      %c0_9 = arith.constant 0 : index
      %11 = vector.load %arg3[%c0_8, %c0_9] : memref<8x512xf32, #tpu.memory_space<vmem>>, vector<8x512xf32>
      tpu.vector_store %arg3[%c0_8, %c0_9], %10 {strides = array<i32>} : memref<8x512xf32, #tpu.memory_space<vmem>>, vector<8x512xf32>,
    } else {
    }
    %c0 = arith.constant 0 : index
    %c0_1 = arith.constant 0 : index
    %3 = vector.load %arg1[%c0, %c0_1] : memref<8x512xf32, #tpu.memory_space<vmem>>, vector<8x512xf32>
    %c0_2 = arith.constant 0 : index
    %c0_3 = arith.constant 0 : index
    %4 = vector.load %arg3[%c0_2, %c0_3] : memref<8x512xf32, #tpu.memory_space<vmem>>, vector<8x512xf32>
    %5 = arith.maximumf %4, %3 : vector<8x512xf32>
    %c0_4 = arith.constant 0 : index
    %c0_5 = arith.constant 0 : index
    %6 = vector.load %arg3[%c0_4, %c0_5] : memref<8x512xf32, #tpu.memory_space<vmem>>, vector<8x512xf32>
    tpu.vector_store %arg3[%c0_4, %c0_5], %5 {strides = array<i32>} : memref<8x512xf32, #tpu.memory_space<vmem>>, vector<8x512xf32>,
    %c0_i32_6 = arith.constant 0 : i32
    %7 = arith.cmpi eq, %arg0, %c0_i32_6 : i32
    %8 = arith.extui %7 : i1 to i32
    %c0_i32_7 = arith.constant 0 : i32
    %9 = arith.cmpi ne, %8, %c0_i32_7 : i32
    scf.if %9 {
      %c0_8 = arith.constant 0 : index
      %c0_9 = arith.constant 0 : index
      %10 = vector.load %arg3[%c0_8, %c0_9] : memref<8x512xf32, #tpu.memory_space<vmem>>, vector<8x512xf32>
      %11 = vector.shape_cast %10 : vector<8x512xf32> to vector<1x8x512xf32>
      %cst = arith.constant dense<0xFF800000> : vector<1xf32>
      %12 = vector.multi_reduction <maximumf>, %11, %cst [1, 2] : vector<1x8x512xf32> to vector<1xf32>
      %13 = vector.shape_cast %12 : vector<1xf32> to vector<1x1x1xf32>
      %14 = vector.extract %13[0, 0, 0] : f32 from vector<1x1x1xf32>
      %15 = vector.broadcast %14 : f32 to vector<8x128xf32>
      %c0_10 = arith.constant 0 : index
      %c0_11 = arith.constant 0 : index
      %16 = vector.load %arg2[%c0_10, %c0_11] : memref<8x128xf32, #tpu.memory_space<vmem>>, vector<8x128xf32>
      tpu.vector_store %arg2[%c0_10, %c0_11], %15 {strides = array<i32>} : memref<8x128xf32, #tpu.memory_space<vmem>>, vector<8x128xf32>,
    } else {
    }
    return
  }
  func.func @transform_0(%arg0: i32) -> (i32, i32) {
    %c0_i32 = arith.constant 0 : i32
    %c0_i32_0 = arith.constant 0 : i32
    return %arg0, %c0_i32 : i32, i32
  }
  func.func @transform_1(%arg0: i32) -> (i32, i32) {
    %c0_i32 = arith.constant 0 : i32
    %c0_i32_0 = arith.constant 0 : i32
    %c0_i32_1 = arith.constant 0 : i32
    return %c0_i32, %c0_i32_0 : i32, i32
  }
}

</mosaic_0001>

<bundles_post_ra>
// kernel: tpu_custom_call.1
= control target key start
LH: loop header
LB: loop body
LE: loop exit
PB: predicated region body
PF: predicated region fallthrough
CT: control target
= control target key end

     0   :  { %6 = vsyncpa [#allocation4], 0  ;;  %s159_s0 = inlined_call_operand.hbm [shape: f32[8,512], index: 0, kind: input, shape index: {}]   ;;  %s160_s1 = inlined_call_operand.hbm [shape: f32[8,128], index: 1, kind: output, shape index: {}]  }
   0x1   :  { %7 = vsyncpa [#allocation5], 0  ;;  %s13_s8 = sshll.u32 %s159_s0, 4  ;;  %s141_s9 = smov [#allocation3]   ;;  %s14_s8 = int_to_ptr.hbm [resolvable:$true] %s13_s8 }
   0x2   :  { %s15_s10 = sshll.u32 %s141_s9, 4  ;;  %s16_s10 = int_to_ptr.vmem [resolvable:$true] %s15_s10 }
   0x3   :  { %18 = dma.hbm_to_vmem [thread:$0]  %s14_s8, 512, %s16_s10, [#allocation4]  }
   0x4   :  { %137 = dma.done.wait [#allocation4], 512  }
   0x5   :  { %138 = vsyncadd [#allocation4], 4294966784  ;;  %v31_v0 = vld [vmem:[#allocation3] sm:$0xff]  ;;  %v32_v1 = vld [vmem:[#allocation3 + $0x8] sm:$0xff]  ;;  %s142_s0 = smov [#allocation6]   ;;  %s75_s14 = sshll.u32 %s160_s1, 4  ;;  %s76_s14 = int_to_ptr.hbm [resolvable:$true] %s75_s14 }
   0x6   :  { %v33_v2 = vld [vmem:[#allocation3 + $0x10] sm:$0xff]  ;;  %v34_v3 = vld [vmem:[#allocation3 + $0x18] sm:$0xff]  ;;  %v54_v4 = vmax.f32 %v31_v0, %v32_v1  ;;  %s73_s11 = sshll.u32 %s142_s0, 4  ;;  %s74_s11 = int_to_ptr.vmem [resolvable:$true] %s73_s11 }
   0x7   :  { %v55_v5 = vmax.f32 %v33_v2, %v34_v3 }
   0x9   :  { %v56_v6 = vmax.f32 %v54_v4, %v55_v5 }
   0xb   :  { %57 = vmax.xlane.f32.xlu0 %v56_v6 }
  0x7e   :  { %v58_v7 = vpop.xlane.xlu0 %57 }
  0x7f   :  { %v59_v8 = vrot.slane %v58_v7, 4 }
  0x81   :  { %v60_v9 = vmax.f32 %v58_v7, %v59_v8 }
  0x83   :  { %v61_v10 = vrot.slane %v60_v9, 2 }
  0x85   :  { %v62_v11 = vmax.f32 %v60_v9, %v61_v10 }
  0x87   :  { %v63_v12 = vrot.slane %v62_v11, 1 }
  0x89   :  { %v64_v13 = vmax.f32 %v62_v11, %v63_v12 }
  0x8b   :  { %85 = vpush %v64_v13 }
  0xbc   :  { %s86_s15 = spop %85 }
  0xbd   :  { %v66_v14 = vstv %s86_s15 }
  0xbe   :  { %67 = vst [vmem:[#allocation6] sm:$0xff] %v66_v14 }
  0xbf   :  { %78 = dma.vmem_to_hbm [thread:$0]  %s74_s11, 128, %s76_s14, [#allocation5]  }
  0xc0   :  { %139 = dma.done.wait [#allocation5], 128  }
  0xc1   :  { %140 = vsyncadd [#allocation5], 4294967168 }
  0xc2   :  { %83 = vsyncpa [#allocation4], 1 }
  0xc3   :  { %84 = vsyncpa [#allocation5], 1 }

</bundles_post_ra>
